<compile_context>
chip_gen: v6e
topology: v6e:2x2x1
jax: 0.10.0
libtpu: 0.0.40
codegen_flags: <defaults>
</compile_context>

<pallas_src>
import functools

import jax
import jax.numpy as jnp
from jax import lax
from jax.experimental import pallas as pl
from jax.experimental.pallas import tpu as pltpu

ALPHA = 0.8
GAMMA = 2
LOG_CLAMP = -100.0  # torch F.binary_cross_entropy clamps log() at -100

ACC_ROWS = 64                                # accumulator height: 8 f32 vregs of ILP
MAX_BLOCK_ROWS = 8192                        # caps each f32 temp at 4 MiB
TARGET_STEP_INPUT_BYTES = 4 * 1024 * 1024    # combined x+t bytes per grid step
VMEM_LIMIT_BYTES = 48 * 1024 * 1024          # safe on v5e/v6e (128 MiB) and v7x (64 MiB)
NUM_PARALLEL = 2                             # dual-TC on v7x; measured no-op on v5e/v6e


def _round_up(x, m):
    return (x + m - 1) // m * m


def _bce_sum_kernel(x_ref, t_ref, o_ref, *, rows, block_rows, blocks_per_p,
                    binary_targets):
    p = pl.program_id(0)
    i = pl.program_id(1)

    @pl.when(i == 0)
    def _():
        o_ref[...] = jnp.zeros_like(o_ref)

    # cast in-kernel (VPU slack) so HBM traffic stays at the native dtype width
    x = x_ref[...].astype(jnp.float32)
    t = t_ref[...].astype(jnp.float32)

    if binary_targets:
        # opt-in hard-target fast path: one log per element (half the EUP work)
        pt = jnp.where(t >= 0.5, x, 1.0 - x)
        s = jnp.maximum(jnp.log(pt), LOG_CLAMP)
    else:
        # general soft-target-safe BCE with torch-style log clamping, rewritten
        # as s = t*(log_x - log_1mx) + log_1mx; bce = -s (negated once outside).
        log_x = jnp.maximum(jnp.log(x), LOG_CLAMP)
        log_1mx = jnp.maximum(jnp.log(1.0 - x), LOG_CLAMP)
        s = t * (log_x - log_1mx) + log_1mx

    block_idx = p * blocks_per_p + i
    row0 = block_idx * block_rows
    is_partial = row0 + block_rows > rows  # last partial block or clamped OOB dup

    # Full blocks: accumulate unmasked (steady-state hot path, no iota/select).
    @pl.when(jnp.logical_not(is_partial))
    def _():
        o_ref[0] += s.reshape(block_rows // ACC_ROWS, ACC_ROWS, 128).sum(axis=0)

    # Partial / duplicated blocks: mask rows past the real data, then accumulate.
    @pl.when(is_partial)
    def _():
        row_iota = lax.broadcasted_iota(jnp.int32, (block_rows, 128), 0)
        sm = jnp.where(row0 + row_iota < rows, s, 0.0)
        o_ref[0] += sm.reshape(block_rows // ACC_ROWS, ACC_ROWS, 128).sum(axis=0)


def _bce_sum_bulk(x2, t2, binary_targets):
    """Sum of elementwise BCE over matching (rows, 128) arrays (native dtypes)."""
    rows = x2.shape[0]

    # Dtype-aware block: ~TARGET_STEP_INPUT_BYTES of combined input per step,
    # capped to keep f32 temporaries bounded and to keep num_blocks >= NUM_PARALLEL
    # (so both TensorCores stay busy on v7x after the block-size bump).
    bytes_per_row = 128 * (x2.dtype.itemsize + t2.dtype.itemsize)
    target_rows = max(ACC_ROWS, TARGET_STEP_INPUT_BYTES // bytes_per_row)
    per_core_cap = _round_up(-(-rows // NUM_PARALLEL), ACC_ROWS)
    block_rows = min(target_rows, MAX_BLOCK_ROWS, per_core_cap)
    block_rows = _round_up(max(block_rows, ACC_ROWS), ACC_ROWS)

    num_blocks = pl.cdiv(rows, block_rows)
    num_par = min(NUM_PARALLEL, num_blocks)
    blocks_per_p = pl.cdiv(num_blocks, num_par)

    def in_map(p, i):
        # clamp so duplicated trailing grid steps never DMA a fully OOB block;
        # their contribution is zeroed by the in-kernel partial-block mask.
        return (jnp.minimum(p * blocks_per_p + i, num_blocks - 1), 0)

    kernel = functools.partial(
        _bce_sum_kernel,
        rows=rows,
        block_rows=block_rows,
        blocks_per_p=blocks_per_p,
        binary_targets=binary_targets,
    )

    n = rows * 128
    partials = pl.pallas_call(
        kernel,
        out_shape=jax.ShapeDtypeStruct((num_par, ACC_ROWS, 128), jnp.float32),
        grid_spec=pltpu.PrefetchScalarGridSpec(
            num_scalar_prefetch=0,
            grid=(num_par, blocks_per_p),
            in_specs=[
                pl.BlockSpec((block_rows, 128), in_map),
                pl.BlockSpec((block_rows, 128), in_map),
            ],
            out_specs=pl.BlockSpec((1, ACC_ROWS, 128), lambda p, i: (p, 0, 0)),
        ),
        compiler_params=pltpu.CompilerParams(
            dimension_semantics=("parallel", "arbitrary"),
            vmem_limit_bytes=VMEM_LIMIT_BYTES,
        ),
        cost_estimate=pl.CostEstimate(
            flops=(4 if binary_targets else 6) * n,
            transcendentals=(1 if binary_targets else 2) * n,
            bytes_accessed=x2.size * x2.dtype.itemsize
            + t2.size * t2.dtype.itemsize
            + num_par * ACC_ROWS * 128 * 4,
        ),
    )(x2, t2)
    # kernel accumulates s = -bce; negate once here on the scalar total.
    return -jnp.sum(partials, dtype=jnp.float32)


def focal_loss(inputs, targets, alpha=ALPHA, gamma=GAMMA, binary_targets=False):
    """Matches FocalLoss.forward: expects sigmoided inputs; returns scalar f32.

    binary_targets=True is an opt-in fast path (single log) that is only valid
    when targets are hard 0/1 labels; the default is soft-target-safe.
    """
    assert inputs.shape == targets.shape
    n_total = inputs.size

    x_flat = inputs.reshape(-1)
    t_flat = targets.reshape(-1)

    rows = n_total // 128
    n_bulk = rows * 128

    total = jnp.float32(0.0)
    if rows > 0:
        x2 = x_flat[:n_bulk].reshape(rows, 128)
        t2 = t_flat[:n_bulk].reshape(rows, 128)
        total = total + _bce_sum_bulk(x2, t2, binary_targets)

    if n_bulk < n_total:
        # <128 leftover elements: fold in with plain jnp instead of a full-array
        # concatenate/pad pass over HBM.
        xt = x_flat[n_bulk:].astype(jnp.float32)
        tt = t_flat[n_bulk:].astype(jnp.float32)
        log_x = jnp.maximum(jnp.log(xt), LOG_CLAMP)
        log_1mx = jnp.maximum(jnp.log(1.0 - xt), LOG_CLAMP)
        total = total + jnp.sum(-(tt * log_x + (1.0 - tt) * log_1mx))

    bce_mean = total / jnp.float32(n_total)
    bce_exp = jnp.exp(-bce_mean)
    one_minus = 1.0 - bce_exp
    mod = one_minus * one_minus if gamma == 2 else one_minus ** gamma
    return alpha * mod * bce_mean


def focal_loss_ref(inputs, targets, alpha=ALPHA, gamma=GAMMA):
    x = inputs.reshape(-1).astype(jnp.float32)
    t = targets.reshape(-1).astype(jnp.float32)
    log_x = jnp.maximum(jnp.log(x), LOG_CLAMP)
    log_1mx = jnp.maximum(jnp.log(1.0 - x), LOG_CLAMP)
    bce = jnp.mean(-(t * log_x + (1.0 - t) * log_1mx))
    return alpha * (1.0 - jnp.exp(-bce)) ** gamma * bce


if __name__ == "__main__":
    key = jax.random.PRNGKey(0)
    k1, k2, k3, k4 = jax.random.split(key, 4)

    # Primary: NCHW, already-sigmoided inputs and binary targets.
    B, C, H, W = 2, 4, 16, 16
    inputs = jax.nn.sigmoid(jax.random.normal(k1, (B, C, H, W), jnp.float32))
    targets = (jax.random.uniform(k2, (B, C, H, W)) > 0.5).astype(jnp.float32)
    out = jax.block_until_ready(focal_loss(inputs, targets))
    ref = jax.block_until_ready(focal_loss_ref(inputs, targets))
    assert jnp.allclose(out, ref, rtol=1e-5, atol=1e-6), (out, ref)

    # Opt-in hard-target fast path (single log) on the same binary targets.
    out_b = jax.block_until_ready(focal_loss(inputs, targets, binary_targets=True))
    assert jnp.allclose(out_b, ref, rtol=1e-5, atol=1e-6), (out_b, ref)

    # Larger / ragged: exercises multi-block grid, the parallel (dual-TC) axis,
    # unmasked full blocks + masked partial block, the <128-element tail path,
    # and mixed bf16 inputs / f32 targets.
    shape2 = (3, 3, 253, 253)  # 576081 elems = 4500 rows of 128 + tail of 81
    inputs2 = jax.nn.sigmoid(jax.random.normal(k3, shape2, jnp.float32)).astype(jnp.bfloat16)
    targets2 = (jax.random.uniform(k4, shape2) > 0.5).astype(jnp.float32)
    out2 = jax.block_until_ready(focal_loss(inputs2, targets2))
    ref2 = jax.block_until_ready(focal_loss_ref(inputs2, targets2))
    assert jnp.allclose(out2, ref2, rtol=1e-4, atol=1e-6), (out2, ref2)

    # Tiny (<128 elements): pure-jnp fallback path, no kernel launch.
    inputs3 = jax.nn.sigmoid(jax.random.normal(k1, (1, 1, 7, 9), jnp.float32))
    targets3 = (jax.random.uniform(k2, (1, 1, 7, 9)) > 0.5).astype(jnp.float32)
    out3 = jax.block_until_ready(focal_loss(inputs3, targets3))
    ref3 = jax.block_until_ready(focal_loss_ref(inputs3, targets3))
    assert jnp.allclose(out3, ref3, rtol=1e-5, atol=1e-6), (out3, ref3)

    print("KERNEL_OK")
</pallas_src>

<mosaic_0001>
module attributes {stable_mosaic.version = 11 : i64} {
  func.func @_bce_sum_kernel(%arg0: i32, %arg1: i32, %arg2: memref<64x128xf32, #tpu.memory_space<vmem>>, %arg3: memref<64x128xf32, #tpu.memory_space<vmem>>, %arg4: memref<1x64x128xf32, #tpu.memory_space<vmem>>) attributes {dimension_semantics = [#tpu.dimension_semantics<parallel>, #tpu.dimension_semantics<arbitrary>], iteration_bounds = array<i64: 1, 1>, scalar_prefetch = 0 : i64, scratch_operands = 0 : i64, tpu.core_type = #tpu.core_type<tc>, window_params = [{transform_indices = @transform_0, window_bounds = array<i64: 64, 128>}, {transform_indices = @transform_1, window_bounds = array<i64: 64, 128>}, {transform_indices = @transform_2, window_bounds = array<i64: 1, 64, 128>}]} {
    %c0_i32 = arith.constant 0 : i32
    %0 = arith.cmpi eq, %arg1, %c0_i32 : i32
    %1 = arith.extui %0 : i1 to i32
    %c0_i32_0 = arith.constant 0 : i32
    %2 = arith.cmpi ne, %1, %c0_i32_0 : i32
    scf.if %2 {
      %cst_9 = arith.constant 0.000000e+00 : f32
      %26 = vector.broadcast %cst_9 : f32 to vector<1x64x128xf32>
      %c0_10 = arith.constant 0 : index
      %c0_11 = arith.constant 0 : index
      %c0_12 = arith.constant 0 : index
      %27 = vector.load %arg4[%c0_10, %c0_11, %c0_12] : memref<1x64x128xf32, #tpu.memory_space<vmem>>, vector<1x64x128xf32>
      tpu.vector_store %arg4[%c0_10, %c0_11, %c0_12], %26 {strides = array<i32>} : memref<1x64x128xf32, #tpu.memory_space<vmem>>, vector<1x64x128xf32>,
    } else {
    }
    %c0 = arith.constant 0 : index
    %c0_1 = arith.constant 0 : index
    %3 = vector.load %arg2[%c0, %c0_1] : memref<64x128xf32, #tpu.memory_space<vmem>>, vector<64x128xf32>
    %c0_2 = arith.constant 0 : index
    %c0_3 = arith.constant 0 : index
    %4 = vector.load %arg3[%c0_2, %c0_3] : memref<64x128xf32, #tpu.memory_space<vmem>>, vector<64x128xf32>
    %5 = math.log %3 : vector<64x128xf32>
    %cst = arith.constant -1.000000e+02 : f32
    %6 = vector.broadcast %cst : f32 to vector<64x128xf32>
    %7 = arith.maximumf %5, %6 : vector<64x128xf32>
    %cst_4 = arith.constant 1.000000e+00 : f32
    %8 = vector.broadcast %cst_4 : f32 to vector<64x128xf32>
    %9 = arith.subf %8, %3 : vector<64x128xf32>
    %10 = math.log %9 : vector<64x128xf32>
    %cst_5 = arith.constant -1.000000e+02 : f32
    %11 = vector.broadcast %cst_5 : f32 to vector<64x128xf32>
    %12 = arith.maximumf %10, %11 : vector<64x128xf32>
    %13 = arith.subf %7, %12 : vector<64x128xf32>
    %14 = arith.mulf %4, %13 : vector<64x128xf32>
    %15 = arith.addf %14, %12 : vector<64x128xf32>
    %c1_i32 = arith.constant 1 : i32
    %16 = arith.muli %arg0, %c1_i32 : i32
    %17 = arith.addi %16, %arg1 : i32
    %c64_i32 = arith.constant 64 : i32
    %18 = arith.muli %17, %c64_i32 : i32
    %c64_i32_6 = arith.constant 64 : i32
    %19 = arith.addi %18, %c64_i32_6 : i32
    %c16_i32 = arith.constant 16 : i32
    %20 = arith.cmpi sgt, %19, %c16_i32 : i32
    %true = arith.constant true
    %21 = arith.xori %20, %true : i1
    %22 = arith.extui %21 : i1 to i32
    %c0_i32_7 = arith.constant 0 : i32
    %23 = arith.cmpi ne, %22, %c0_i32_7 : i32
    scf.if %23 {
      %c0_9 = arith.constant 0 : index
      %c0_10 = arith.constant 0 : index
      %c0_11 = arith.constant 0 : index
      %26 = vector.load %arg4[%c0_9, %c0_10, %c0_11] : memref<1x64x128xf32, #tpu.memory_space<vmem>>, vector<1x64x128xf32>
      %27 = vector.shape_cast %26 : vector<1x64x128xf32> to vector<64x128xf32>
      %28 = vector.shape_cast %15 : vector<64x128xf32> to vector<1x64x128xf32>
      %cst_12 = arith.constant dense<0.000000e+00> : vector<64x128xf32>
      %29 = vector.multi_reduction <add>, %28, %cst_12 [0] : vector<1x64x128xf32> to vector<64x128xf32>
      %30 = arith.addf %27, %29 : vector<64x128xf32>
      %c0_13 = arith.constant 0 : index
      %c0_14 = arith.constant 0 : index
      %c0_15 = arith.constant 0 : index
      %31 = vector.load %arg4[%c0_13, %c0_14, %c0_15] : memref<1x64x128xf32, #tpu.memory_space<vmem>>, vector<1x64x128xf32>
      %32 = vector.shape_cast %31 : vector<1x64x128xf32> to vector<64x128xf32>
      %33 = vector.shape_cast %30 : vector<64x128xf32> to vector<1x64x128xf32>
      tpu.vector_store %arg4[%c0_13, %c0_14, %c0_15], %33 {strides = array<i32>} : memref<1x64x128xf32, #tpu.memory_space<vmem>>, vector<1x64x128xf32>,
    } else {
    }
    %24 = arith.extui %20 : i1 to i32
    %c0_i32_8 = arith.constant 0 : i32
    %25 = arith.cmpi ne, %24, %c0_i32_8 : i32
    scf.if %25 {
      %26 = tpu.iota {dimensions = array<i32: 0>} : vector<64x128xi32>
      %27 = vector.broadcast %18 : i32 to vector<64x128xi32>
      %28 = arith.addi %27, %26 : vector<64x128xi32>
      %c16_i32_9 = arith.constant 16 : i32
      %29 = vector.broadcast %c16_i32_9 : i32 to vector<64x128xi32>
      %30 = arith.cmpi slt, %28, %29 : vector<64x128xi32>
      %cst_10 = arith.constant 0.000000e+00 : f32
      %31 = vector.broadcast %cst_10 : f32 to vector<64x128xf32>
      %32 = arith.select %30, %15, %31 : vector<64x128xi1>, vector<64x128xf32>
      %c0_11 = arith.constant 0 : index
      %c0_12 = arith.constant 0 : index
      %c0_13 = arith.constant 0 : index
      %33 = vector.load %arg4[%c0_11, %c0_12, %c0_13] : memref<1x64x128xf32, #tpu.memory_space<vmem>>, vector<1x64x128xf32>
      %34 = vector.shape_cast %33 : vector<1x64x128xf32> to vector<64x128xf32>
      %35 = vector.shape_cast %32 : vector<64x128xf32> to vector<1x64x128xf32>
      %cst_14 = arith.constant dense<0.000000e+00> : vector<64x128xf32>
      %36 = vector.multi_reduction <add>, %35, %cst_14 [0] : vector<1x64x128xf32> to vector<64x128xf32>
      %37 = arith.addf %34, %36 : vector<64x128xf32>
      %c0_15 = arith.constant 0 : index
      %c0_16 = arith.constant 0 : index
      %c0_17 = arith.constant 0 : index
      %38 = vector.load %arg4[%c0_15, %c0_16, %c0_17] : memref<1x64x128xf32, #tpu.memory_space<vmem>>, vector<1x64x128xf32>
      %39 = vector.shape_cast %38 : vector<1x64x128xf32> to vector<64x128xf32>
      %40 = vector.shape_cast %37 : vector<64x128xf32> to vector<1x64x128xf32>
      tpu.vector_store %arg4[%c0_15, %c0_16, %c0_17], %40 {strides = array<i32>} : memref<1x64x128xf32, #tpu.memory_space<vmem>>, vector<1x64x128xf32>,
    } else {
    }
    return
  }
  func.func @transform_0(%arg0: i32, %arg1: i32) -> (i32, i32) {
    %c1_i32 = arith.constant 1 : i32
    %0 = arith.muli %arg0, %c1_i32 : i32
    %1 = arith.addi %0, %arg1 : i32
    %c0_i32 = arith.constant 0 : i32
    %2 = arith.minsi %1, %c0_i32 : i32
    %c0_i32_0 = arith.constant 0 : i32
    %c0_i32_1 = arith.constant 0 : i32
    return %2, %c0_i32_0 : i32, i32
  }
  func.func @transform_1(%arg0: i32, %arg1: i32) -> (i32, i32) {
    %c1_i32 = arith.constant 1 : i32
    %0 = arith.muli %arg0, %c1_i32 : i32
    %1 = arith.addi %0, %arg1 : i32
    %c0_i32 = arith.constant 0 : i32
    %2 = arith.minsi %1, %c0_i32 : i32
    %c0_i32_0 = arith.constant 0 : i32
    %c0_i32_1 = arith.constant 0 : i32
    return %2, %c0_i32_0 : i32, i32
  }
  func.func @transform_2(%arg0: i32, %arg1: i32) -> (i32, i32, i32) {
    %c0_i32 = arith.constant 0 : i32
    %c0_i32_0 = arith.constant 0 : i32
    %c0_i32_1 = arith.constant 0 : i32
    return %arg0, %c0_i32, %c0_i32_0 : i32, i32, i32
  }
}

</mosaic_0001>

<bundles_post_ra>
// kernel: tpu_custom_call.1
= control target key start
LH: loop header
LB: loop body
LE: loop exit
PB: predicated region body
PF: predicated region fallthrough
CT: control target
= control target key end

     0   :  { %7 = vsyncpa [#allocation3], 0  ;;  %s430_s0 = inlined_call_operand.hbm [shape: f32[16,128], index: 0, kind: input, shape index: {}]   ;;  %s431_s1 = inlined_call_operand.hbm [shape: f32[16,128], index: 1, kind: input, shape index: {}]   ;;  %s432_s2 = inlined_call_operand.hbm [shape: f32[1,64,128], index: 2, kind: output, shape index: {}]  }
   0x1   :  { %8 = vsyncpa [#allocation6], 0 }
   0x2   :  { %9 = vsyncpa [#allocation4], 0 }
   0x3   :  { %20 = vsyncadd [#allocation3], 768  ;;  %s391_s9 = smov [#allocation2]  }
   0x4   :  { %s25_s10 = sshll.u32 %s391_s9, 4  ;;  %s26_s10 = int_to_ptr.vmem [resolvable:$true] %s25_s10 }
   0x5   :  { %s333_s11 = scalar_lea.vmem %s26_s10, 256  ;;  %s337_s12 = scalar_lea.vmem %s26_s10, 1024 }
   0x6   :  { %p334_p0 = scmp.ne.s32.totalorder %s26_s10, %s333_s11  ;;  %p338_p1 = scmp.lt.s32.totalorder %s26_s10, %s26_s10 }
   0x7   :  { %p339_p2 = scmp.lt.s32.totalorder %s337_s12, %s333_s11 }
   0x9   :  { %p340_p3 = por %p339_p2, %p338_p1 }
   0xb   :  { %p341_p4 = pnand %p340_p3, %p334_p0 }
   0xd   :  { %344 = shalt.err (!%p341_p4)
}
   0xe   :  { %s392_s13 = smov 128   ;;  %s393_s14 = smov 8  }
   0xf   :  { %31 = dma.hbm_to_vmem [thread:$0]  %s430_s0, 256, %s26_s10, [#allocation3], %s392_s13, %s392_s13, %s393_s14  }
  0x10   :  { %42 = vsyncadd [#allocation6], 768  ;;  %s394_s17 = smov [#allocation5]  }
  0x11   :  { %s47_s18 = sshll.u32 %s394_s17, 4  ;;  %s48_s18 = int_to_ptr.vmem [resolvable:$true] %s47_s18 }
  0x12   :  { %s353_s19 = scalar_lea.vmem %s48_s18, 256  ;;  %s357_s20 = scalar_lea.vmem %s48_s18, 1024 }
  0x13   :  { %p354_p5 = scmp.ne.s32.totalorder %s48_s18, %s353_s19  ;;  %p358_p6 = scmp.lt.s32.totalorder %s48_s18, %s48_s18 }
  0x14   :  { %p359_p7 = scmp.lt.s32.totalorder %s357_s20, %s353_s19 }
  0x16   :  { %p360_p8 = por %p359_p7, %p358_p6 }
  0x18   :  { %p361_p9 = pnand %p360_p8, %p354_p5 }
  0x1a   :  { %364 = shalt.err (!%p361_p9)
}
  0x1b   :  { %53 = dma.hbm_to_vmem [thread:$0]  %s431_s1, 256, %s48_s18, [#allocation6], %s392_s13, %s392_s13, %s393_s14  }
  0x1c   :  { %385 = dma.done.wait [#allocation3], 1024  }
  0x1d   :  { %386 = vsyncadd [#allocation3], 4294966272 }
  0x1e   :  { %387 = dma.done.wait [#allocation6], 1024  }
  0x1f   :  { %388 = vsyncadd [#allocation6], 4294966272  ;;  %v395_v0 = vmov 0.0   ;;  %v84_v1 = vld [vmem:[#allocation2] sm:$0xff]  ;;  %v85_v2 = vld [vmem:[#allocation2 + $0x8] sm:$0xff]  ;;  %s396_s0 = smov [#allocation7]  }
  0x20   :  { %283 = vst [vmem:[#allocation7 + $0x10] sm:$0xff] %v395_v0  ;;  %284 = vst [vmem:[#allocation7 + $0x18] sm:$0xff] %v395_v0  ;;  %317 = vlog2.f32 %v84_v1  ;;  %v124_v3 = vsub.f32 1.0, %v84_v1  ;;  %v125_v4 = vsub.f32 1.0, %v85_v2  ;;  %v92_v16 = vld [vmem:[#allocation5] sm:$0xff]  ;;  %v93_v19 = vld [vmem:[#allocation5 + $0x8] sm:$0xff] }
  0x21   :  { %285 = vst [vmem:[#allocation7 + $0x20] sm:$0xff] %v395_v0  ;;  %286 = vst [vmem:[#allocation7 + $0x28] sm:$0xff] %v395_v0  ;;  %319 = vlog2.f32 %v85_v2  ;;  %s294_s1 = sshll.u32 %s396_s0, 4  ;;  %s295_s1 = int_to_ptr.vmem [resolvable:$true] %s294_s1 }
  0x22   :  { %287 = vst [vmem:[#allocation7 + $0x30] sm:$0xff] %v395_v0  ;;  %288 = vst [vmem:[#allocation7 + $0x38] sm:$0xff] %v395_v0  ;;  %321 = vlog2.f32 %v124_v3  ;;  %s365_s23 = scalar_lea.vmem %s295_s1, 1024  ;;  %p370_p11 = scmp.lt.s32.totalorder %s295_s1, %s295_s1 }
  0x23   :  { %323 = vlog2.f32 %v125_v4  ;;  %p366_p10 = scmp.ne.s32.totalorder %s295_s1, %s365_s23  ;;  %p371_p12 = scmp.lt.s32.totalorder %s365_s23, %s365_s23 }
  0x25   :  { %p372_p13 = por %p371_p12, %p370_p11 }
  0x27   :  { %p373_p0 = pnand %p372_p13, %p366_p10 }
  0x2d   :  { %v318_v5 = vpop.eup %317 }
  0x2e   :  { %v320_v6 = vpop.eup %319  ;;  %v101_v7 = vmul.f32 0.6931472, %v318_v5 }
  0x2f   :  { %v322_v8 = vpop.eup %321  ;;  %v103_v9 = vmul.f32 0.6931472, %v320_v6 }
  0x30   :  { %v324_v10 = vpop.eup %323  ;;  %v116_v11 = vmax.f32 %v101_v7, -100.0  ;;  %v133_v12 = vmul.f32 0.6931472, %v322_v8 }
  0x31   :  { %v117_v13 = vmax.f32 %v103_v9, -100.0  ;;  %v135_v14 = vmul.f32 0.6931472, %v324_v10 }
  0x32   :  { %v148_v15 = vmax.f32 %v133_v12, -100.0 }
  0x33   :  { %v149_v17 = vmax.f32 %v135_v14, -100.0 }
  0x34   :  { %v156_v18 = vsub.f32 %v116_v11, %v148_v15 }
  0x35   :  { %v157_v20 = vsub.f32 %v117_v13, %v149_v17 }
  0x36   :  { %v164_v21 = vmul.f32 %v156_v18, %v92_v16 }
  0x37   :  { %v165_v22 = vmul.f32 %v157_v20, %v93_v19 }
  0x38   :  { %v172_v23 = vadd.f32 %v164_v21, %v148_v15 }
  0x39   :  { %v173_v24 = vadd.f32 %v165_v22, %v149_v17 }
  0x3a   :  { %281 = vst [vmem:[#allocation7] sm:$0xff] %v172_v23 }
  0x3b   :  { %282 = vst [vmem:[#allocation7 + $0x8] sm:$0xff] %v173_v24 }
  0x3c   :  { %376 = shalt.err (!%p373_p0)
}
  0x3d   :  { %300 = dma.vmem_to_hbm [thread:$0]  %s295_s1, 1024, %s432_s2, [#allocation4], %s392_s13, %s392_s13, %s393_s14  }
  0x3e   :  { %389 = dma.done.wait [#allocation4], 1024  }
  0x3f   :  { %390 = vsyncadd [#allocation4], 4294966272 }
  0x40   :  { %304 = vsyncpa [#allocation3], 1 }
  0x41   :  { %305 = vsyncpa [#allocation6], 1 }
  0x42   :  { %306 = vsyncpa [#allocation4], 1 }

</bundles_post_ra>
